<compile_context>
chip_gen: v7x
topology: tpu7x:2x2x1
jax: 0.10.0
libtpu: 0.0.40
codegen_flags: <defaults>
</compile_context>

<pallas_src>
import functools

import jax
import jax.numpy as jnp
from jax.experimental import pallas as pl
from jax.experimental.pallas import tpu as pltpu

IN_DIM = 3 * 32 * 32   # 3072
OUT = 10
OUT_PAD = 128          # pad logits to one full 128-lane group


def lr_kernel(x_ref, w_ref, b_ref, o_ref):
    # x_ref: (TILE_B, IN_DIM) f32    w_ref: (IN_DIM, OUT_PAD) bf16
    # b_ref: (1, OUT_PAD) f32        o_ref: (TILE_B, OUT_PAD) f32
    x_bf = x_ref[...].astype(jnp.bfloat16)          # in-kernel cast (VPU, free slot)
    acc = jnp.dot(x_bf, w_ref[...], preferred_element_type=jnp.float32)
    o_ref[...] = acc + b_ref[...]


def _round_up(n, m):
    return ((n + m - 1) // m) * m


def _choose_tile(B, tile_b):
    # Multiple of 8 (sublane), capped at tile_b, and small enough that the
    # grid has >= 2 steps when B allows it (megacore on v7x).
    tb = min(tile_b, _round_up(pl.cdiv(B, 2), 8))
    return max(tb, 8)


@functools.partial(jax.jit, static_argnames=("tile_b",))
def lr_forward(x_nchw, params, *, tile_b=1024):
    """x_nchw: (B, 3, 32, 32) float32.  Returns logits (B, 10) float32."""
    w, b = params                      # w: (IN_DIM, OUT) f32, b: (OUT,) f32
    B = x_nchw.shape[0]
    x_flat = x_nchw.reshape(B, -1)     # same row-major flatten as x.view(B, -1)

    tb = _choose_tile(B, tile_b)
    n_tiles = pl.cdiv(B, tb)           # partial last block handled by Pallas

    # Pad the output dim to 128 lanes; weight goes to bf16 (fuses under jit).
    w_p = jnp.pad(w, ((0, 0), (0, OUT_PAD - OUT))).astype(jnp.bfloat16)
    b_p = jnp.pad(b.reshape(1, OUT).astype(jnp.float32),
                  ((0, 0), (0, OUT_PAD - OUT)))

    cost = pl.CostEstimate(
        flops=2 * n_tiles * tb * IN_DIM * OUT_PAD,
        bytes_accessed=(x_flat.size * 4 + w_p.size * 2 + b_p.size * 4
                        + B * OUT_PAD * 4),
        transcendentals=0,
    )

    out_padded = pl.pallas_call(
        lr_kernel,
        out_shape=jax.ShapeDtypeStruct((B, OUT_PAD), jnp.float32),
        grid=(n_tiles,),
        in_specs=[
            pl.BlockSpec((tb, IN_DIM), lambda i: (i, 0)),       # streamed x tiles (f32)
            pl.BlockSpec((IN_DIM, OUT_PAD), lambda i: (0, 0)),  # resident bf16 weight
            pl.BlockSpec((1, OUT_PAD), lambda i: (0, 0)),       # resident bias
        ],
        out_specs=pl.BlockSpec((tb, OUT_PAD), lambda i: (i, 0)),
        compiler_params=pltpu.CompilerParams(
            dimension_semantics=("parallel",),
            vmem_limit_bytes=48 << 20,   # fits tb=1024 f32 double-buffer on v5e/v6e/v7x
        ),
        cost_estimate=cost,
    )(x_flat, w_p, b_p)

    return out_padded[:, :OUT]


def init_params(key):
    """Deterministic synthetic parameters matching nn.Linear(3072, 10),
    stored transposed: W as (in, out), b as (out,)."""
    kw, kb = jax.random.split(key)
    w = jax.random.normal(kw, (IN_DIM, OUT), jnp.float32) * (1.0 / IN_DIM ** 0.5)
    b = jax.random.normal(kb, (OUT,), jnp.float32) * 0.01
    return (w, b)


def lr_reference_f32(x_nchw, params):
    w, b = params
    x = x_nchw.reshape(x_nchw.shape[0], -1)
    return x @ w + b


def lr_reference_bf16(x_nchw, params):
    # Same math as the kernel: bf16-rounded operands, f32 accumulation.
    w, b = params
    x = x_nchw.reshape(x_nchw.shape[0], -1)
    xb = x.astype(jnp.bfloat16).astype(jnp.float32)
    wb = w.astype(jnp.bfloat16).astype(jnp.float32)
    return xb @ wb + b


if __name__ == "__main__":
    key = jax.random.PRNGKey(0)
    kx, kp = jax.random.split(key)

    B = 2
    x = jax.random.normal(kx, (B, 3, 32, 32), jnp.float32)  # CIFAR-10 NCHW
    params = init_params(kp)

    out = jax.block_until_ready(lr_forward(x, params))

    ref_bf16 = lr_reference_bf16(x, params)
    ref_f32 = lr_reference_f32(x, params)

    assert out.shape == (B, OUT), out.shape
    # Tight check vs. the exact bf16-operand / f32-accumulate math the kernel does.
    assert jnp.allclose(out, ref_bf16, atol=2e-3, rtol=2e-3), (
        float(jnp.max(jnp.abs(out - ref_bf16)))
    )
    # Loose check vs. the full-precision PyTorch-equivalent forward.
    assert jnp.allclose(out, ref_f32, atol=5e-2, rtol=5e-2), (
        float(jnp.max(jnp.abs(out - ref_f32)))
    )
    print("KERNEL_OK")
</pallas_src>

<mosaic_0001>
module attributes {stable_mosaic.version = 11 : i64} {
  func.func @lr_kernel(%arg0: i32, %arg1: memref<8x3072xf32, #tpu.memory_space<vmem>>, %arg2: memref<3072x128xbf16, #tpu.memory_space<vmem>>, %arg3: memref<1x128xf32, #tpu.memory_space<vmem>>, %arg4: memref<8x128xf32, #tpu.memory_space<vmem>>) attributes {dimension_semantics = [#tpu.dimension_semantics<parallel>], iteration_bounds = array<i64: 1>, scalar_prefetch = 0 : i64, scratch_operands = 0 : i64, tpu.core_type = #tpu.core_type<tc>, window_params = [{transform_indices = @transform_0, window_bounds = array<i64: 8, 3072>}, {pipeline_mode = #tpu.pipeline_mode<synchronous>, transform_indices = @transform_1, window_bounds = array<i64: 3072, 128>}, {pipeline_mode = #tpu.pipeline_mode<synchronous>, transform_indices = @transform_2, window_bounds = array<i64: 1, 128>}, {transform_indices = @transform_3, window_bounds = array<i64: 8, 128>}]} {
    %c0 = arith.constant 0 : index
    %c0_0 = arith.constant 0 : index
    %0 = vector.load %arg1[%c0, %c0_0] : memref<8x3072xf32, #tpu.memory_space<vmem>>, vector<8x3072xf32>
    %1 = arith.truncf %0 : vector<8x3072xf32> to vector<8x3072xbf16>
    %c0_1 = arith.constant 0 : index
    %c0_2 = arith.constant 0 : index
    %2 = vector.load %arg2[%c0_1, %c0_2] : memref<3072x128xbf16, #tpu.memory_space<vmem>>, vector<3072x128xbf16>
    %cst = arith.constant dense<0.000000e+00> : vector<8x128xf32>
    %3 = tpu.matmul %1, %2, %cst {dimension_numbers = #tpu.dot_dimension_numbers<[1], [0], [0], [1], [0, 0, 1, 1], [], []>} : vector<8x3072xbf16>, vector<3072x128xbf16>, vector<8x128xf32> -> vector<8x128xf32>
    %c0_3 = arith.constant 0 : index
    %c0_4 = arith.constant 0 : index
    %4 = vector.load %arg3[%c0_3, %c0_4] : memref<1x128xf32, #tpu.memory_space<vmem>>, vector<1x128xf32>
    %5 = vector.broadcast %4 : vector<1x128xf32> to vector<8x128xf32>
    %6 = arith.addf %3, %5 : vector<8x128xf32>
    %c0_5 = arith.constant 0 : index
    %c0_6 = arith.constant 0 : index
    %7 = vector.load %arg4[%c0_5, %c0_6] : memref<8x128xf32, #tpu.memory_space<vmem>>, vector<8x128xf32>
    tpu.vector_store %arg4[%c0_5, %c0_6], %6 {strides = array<i32>} : memref<8x128xf32, #tpu.memory_space<vmem>>, vector<8x128xf32>,
    return
  }
  func.func @transform_0(%arg0: i32) -> (i32, i32) {
    %c0_i32 = arith.constant 0 : i32
    %c0_i32_0 = arith.constant 0 : i32
    return %arg0, %c0_i32 : i32, i32
  }
  func.func @transform_1(%arg0: i32) -> (i32, i32) {
    %c0_i32 = arith.constant 0 : i32
    %c0_i32_0 = arith.constant 0 : i32
    %c0_i32_1 = arith.constant 0 : i32
    return %c0_i32, %c0_i32_0 : i32, i32
  }
  func.func @transform_2(%arg0: i32) -> (i32, i32) {
    %c0_i32 = arith.constant 0 : i32
    %c0_i32_0 = arith.constant 0 : i32
    %c0_i32_1 = arith.constant 0 : i32
    return %c0_i32, %c0_i32_0 : i32, i32
  }
  func.func @transform_3(%arg0: i32) -> (i32, i32) {
    %c0_i32 = arith.constant 0 : i32
    %c0_i32_0 = arith.constant 0 : i32
    return %arg0, %c0_i32 : i32, i32
  }
}

</mosaic_0001>

<bundles_post_ra>
// kernel: lr_forward.1
= control target key start
LH: loop header
LB: loop body
LE: loop exit
PB: predicated region body
PF: predicated region fallthrough
CT: control target
= control target key end

     0   :  { %8 = vsyncpa [#allocation3], 0  ;;  %v71_v29 = vlaneseq  ;;  %v3081_v34 = vmov 1983009808   ;;  %s3794_s0 = inlined_call_operand.vmem [shape: f32[2,3072], index: 0, kind: input, shape index: {}]   ;;  %s3795_s1 = inlined_call_operand.vmem [shape: bf16[3072,128], index: 1, kind: input, shape index: {}]   ;;  %s3796_s2 = inlined_call_operand.vmem [shape: f32[1,128], index: 2, kind: input, shape index: {}]   ;;  %s3797_s3 = inlined_call_operand.hbm [shape: f32[2,128], index: 3, kind: output, shape index: {}]  }
   0x1   :  { %v2829_v0 = vld [vmem:[%s3795_s1 + $0x40] sm:$0xff]   ;;  %v2833_v4 = vld [vmem:[%s3795_s1 + $0x48] sm:$0xff]   ;;  %v2837_v8 = vld [vmem:[%s3795_s1 + $0x50] sm:$0xff]   ;;  %v69_v35 = vunpack.c.l.s4 %v3081_v34 }
   0x2   :  { %v2830_v1 = vld [vmem:[%s3795_s1 + $0xc0] sm:$0xff]   ;;  %2561 = vmatprep.subr.bf16.mxu0 %v2829_v0  ;;  %v2834_v5 = vld [vmem:[%s3795_s1 + $0xc8] sm:$0xff]   ;;  %v2838_v9 = vld [vmem:[%s3795_s1 + $0xd0] sm:$0xff]   ;;  %v72_v36 = vshrl.u32 %v71_v29, 7 }
   0x3   :  { %v2831_v2 = vld [vmem:[%s3795_s1] sm:$0xff]   ;;  %2583 = vmatprep.subr.bf16.mxu1 %v2830_v1  ;;  %v2835_v6 = vld [vmem:[%s3795_s1 + $0x8] sm:$0xff]   ;;  %v2839_v10 = vld [vmem:[%s3795_s1 + $0x10] sm:$0xff]   ;;  %v70_v40 = vunpack.c.0.s8 %v69_v35 }
   0x4   :  { %v2832_v3 = vld [vmem:[%s3795_s1 + $0x80] sm:$0xff]   ;;  %2562 = vmatpush3.bf16.msra.mxu0 %v2831_v2  ;;  %v2836_v7 = vld [vmem:[%s3795_s1 + $0x88] sm:$0xff]   ;;  %v2840_v11 = vld [vmem:[%s3795_s1 + $0x90] sm:$0xff]  }
   0x5   :  { %2584 = vmatpush3.bf16.msra.mxu1 %v2832_v3  ;;  %2563 = vmatprep.subr.bf16.mxu0 %v2833_v4  ;;  %v2841_v12 = vld [vmem:[%s3795_s1 + $0x58] sm:$0xff]   ;;  %v2845_v16 = vld [vmem:[%s3795_s1 + $0x60] sm:$0xff]   ;;  %v2849_v20 = vld [vmem:[%s3795_s1 + $0x68] sm:$0xff]   ;;  %v3219_v43 = vsub.s32 %v70_v40, %v72_v36 }
   0x6   :  { %2585 = vmatprep.subr.bf16.mxu1 %v2834_v5  ;;  %v2842_v13 = vld [vmem:[%s3795_s1 + $0xd8] sm:$0xff]   ;;  %v2846_v17 = vld [vmem:[%s3795_s1 + $0xe0] sm:$0xff]   ;;  %v2850_v21 = vld [vmem:[%s3795_s1 + $0xe8] sm:$0xff]  }
   0x7   :  { %v2843_v14 = vld [vmem:[%s3795_s1 + $0x18] sm:$0xff]   ;;  %v2847_v18 = vld [vmem:[%s3795_s1 + $0x20] sm:$0xff]   ;;  %v2851_v22 = vld [vmem:[%s3795_s1 + $0x28] sm:$0xff]  }
   0x8   :  { %2564 = vmatpush3.bf16.msra.mxu0 %v2835_v6  ;;  %v2844_v15 = vld [vmem:[%s3795_s1 + $0x98] sm:$0xff]   ;;  %v2848_v19 = vld [vmem:[%s3795_s1 + $0xa0] sm:$0xff]   ;;  %v2852_v23 = vld [vmem:[%s3795_s1 + $0xa8] sm:$0xff]  }
   0x9   :  { %2586 = vmatpush3.bf16.msra.mxu1 %v2836_v7  ;;  %2565 = vmatprep.subr.bf16.mxu0 %v2837_v8  ;;  %v2853_v24 = vld [vmem:[%s3795_s1 + $0x70] sm:$0xff]   ;;  %v2857_v28 = vld [vmem:[%s3795_s1 + $0x78] sm:$0xff]   ;;  %v2867_v41 = vld [vmem:[%s3795_s1 + $0x140] sm:$0xff]  }
   0xa   :  { %2587 = vmatprep.subr.bf16.mxu1 %v2838_v9  ;;  %v2854_v25 = vld [vmem:[%s3795_s1 + $0xf0] sm:$0xff]   ;;  %v2858_v30 = vld [vmem:[%s3795_s1 + $0xf8] sm:$0xff]   ;;  %v2868_v42 = vld [vmem:[%s3795_s1 + $0x1c0] sm:$0xff]  }
   0xb   :  { %v2855_v26 = vld [vmem:[%s3795_s1 + $0x30] sm:$0xff]   ;;  %v2859_v31 = vld [vmem:[%s3795_s1 + $0x38] sm:$0xff]   ;;  %v2869_v52 = vld [vmem:[%s3795_s1 + $0x100] sm:$0xff]  }
   0xc   :  { %2566 = vmatpush3.bf16.msra.mxu0 %v2839_v10  ;;  %v2856_v27 = vld [vmem:[%s3795_s1 + $0xb0] sm:$0xff]   ;;  %v2860_v32 = vld [vmem:[%s3795_s1 + $0xb8] sm:$0xff]   ;;  %v2870_v53 = vld [vmem:[%s3795_s1 + $0x180] sm:$0xff]  }
   0xd   :  { %2588 = vmatpush3.bf16.msra.mxu1 %v2840_v11  ;;  %2567 = vmatprep.subr.bf16.mxu0 %v2841_v12  ;;  %v2861_v33 = vld [vmem:[%s3794_s0] ss:$48 sps:$4 sm:$0xff]   ;;  %v2865_v38 = vld [vmem:[%s3794_s0 + $0x4] ss:$48 sps:$4 sm:$0xff]   ;;  %v2871_v58 = vld [vmem:[%s3795_s1 + $0x148] sm:$0xff]  }
   0xe   :  { %2589 = vmatprep.subr.bf16.mxu1 %v2842_v13  ;;  %v2863_v37 = vld [vmem:[%s3794_s0 + $0x60] ss:$48 sps:$4 sm:$0xff]   ;;  %v2866_v39 = vld [vmem:[%s3794_s0 + $0x64] ss:$48 sps:$4 sm:$0xff]   ;;  %v74_v44 = vrot.slane %v2861_v33, %v3219_v43  ;;  %v81_v46 = vrot.slane %v2865_v38, %v3219_v43  ;;  %v2872_v59 = vld [vmem:[%s3795_s1 + $0x1c8] sm:$0xff]  }
   0xf   :  { %v88_v45 = vrot.slane %v2863_v37, %v3219_v43  ;;  %v95_v47 = vrot.slane %v2866_v39, %v3219_v43  ;;  %v2873_v60 = vld [vmem:[%s3795_s1 + $0x108] sm:$0xff]   ;;  %v2875_v62 = vld [vmem:[%s3795_s1 + $0x150] sm:$0xff]   ;;  %v2879_v2 = vld [vmem:[%s3795_s1 + $0x158] sm:$0xff]  }
  0x10   :  { %2568 = vmatpush3.bf16.msra.mxu0 %v2843_v14  ;;  %v2874_v61 = vld [vmem:[%s3795_s1 + $0x188] sm:$0xff]   ;;  %v2876_v63 = vld [vmem:[%s3795_s1 + $0x1d0] sm:$0xff]   ;;  %v2880_v3 = vld [vmem:[%s3795_s1 + $0x1d8] sm:$0xff]  }
  0x11   :  { %2590 = vmatpush3.bf16.msra.mxu1 %v2844_v15  ;;  %2569 = vmatprep.subr.bf16.mxu0 %v2845_v16  ;;  %v97_v48 = vcombine.high %v74_v44, %v88_v45  ;;  %v99_v49 = vcombine.high %v81_v46, %v95_v47  ;;  %v96_v50 = vcombine.low %v74_v44, %v88_v45  ;;  %v2877_v0 = vld [vmem:[%s3795_s1 + $0x110] sm:$0xff]   ;;  %v2881_v4 = vld [vmem:[%s3795_s1 + $0x118] sm:$0xff]   ;;  %v2883_v6 = vld [vmem:[%s3795_s1 + $0x160] sm:$0xff]  }
  0x12   :  { %2591 = vmatprep.subr.bf16.mxu1 %v2846_v17  ;;  %v98_v51 = vcombine.low %v81_v46, %v95_v47  ;;  %v2878_v1 = vld [vmem:[%s3795_s1 + $0x190] sm:$0xff]   ;;  %v2882_v5 = vld [vmem:[%s3795_s1 + $0x198] sm:$0xff]   ;;  %v2884_v7 = vld [vmem:[%s3795_s1 + $0x1e0] sm:$0xff]  }
  0x13   :  { %v305_v54 = vpack.c.bf16 %v97_v48, %v97_v48  ;;  %v307_v55 = vpack.c.bf16 %v99_v49, %v99_v49  ;;  %v304_v56 = vpack.c.bf16 %v96_v50, %v96_v50  ;;  %v2885_v8 = vld [vmem:[%s3795_s1 + $0x120] sm:$0xff]   ;;  %v2887_v10 = vld [vmem:[%s3795_s1 + $0x168] sm:$0xff]   ;;  %v2891_v14 = vld [vmem:[%s3795_s1 + $0x170] sm:$0xff]  }
  0x14   :  { %2570 = vmatpush3.bf16.msra.mxu0 %v2847_v18  ;;  %v306_v57 = vpack.c.bf16 %v98_v51, %v98_v51  ;;  %v2886_v9 = vld [vmem:[%s3795_s1 + $0x1a0] sm:$0xff]   ;;  %v2888_v11 = vld [vmem:[%s3795_s1 + $0x1e8] sm:$0xff]   ;;  %v2892_v15 = vld [vmem:[%s3795_s1 + $0x1f0] sm:$0xff]  }
  0x15   :  { %2592 = vmatpush3.bf16.msra.mxu1 %v2848_v19  ;;  %2571 = vmatprep.subr.bf16.mxu0 %v2849_v20  ;;  %v2889_v12 = vld [vmem:[%s3795_s1 + $0x128] sm:$0xff]   ;;  %v2893_v16 = vld [vmem:[%s3795_s1 + $0x130] sm:$0xff]   ;;  %v2895_v18 = vld [vmem:[%s3795_s1 + $0x178] sm:$0xff]  }
  0x16   :  { %2593 = vmatprep.subr.bf16.mxu1 %v2850_v21  ;;  %1903 = vmatprep.mubr.bf16.mxu0 %v305_v54  ;;  %v2890_v13 = vld [vmem:[%s3795_s1 + $0x1a8] sm:$0xff]   ;;  %v2894_v17 = vld [vmem:[%s3795_s1 + $0x1b0] sm:$0xff]   ;;  %v2896_v19 = vld [vmem:[%s3795_s1 + $0x1f8] sm:$0xff]  }
  0x17   :  { %1943 = vmatprep.mubr.bf16.mxu1 %v307_v55  ;;  %v2899_v20 = vld [vmem:[%s3794_s0 + $0x8] ss:$48 sps:$4 sm:$0xff]   ;;  %v2906_v33 = vld [vmem:[%s3795_s1 + $0x2c0] sm:$0xff]   ;;  %v2913_v47 = vld [vmem:[%s3795_s1 + $0x250] sm:$0xff]  }
  0x18   :  { %2572 = vmatpush3.bf16.msra.mxu0 %v2851_v22  ;;  %v2901_v21 = vld [vmem:[%s3794_s0 + $0x68] ss:$48 sps:$4 sm:$0xff]   ;;  %v2907_v36 = vld [vmem:[%s3795_s1 + $0x200] sm:$0xff]   ;;  %v2914_v48 = vld [vmem:[%s3795_s1 + $0x2d0] sm:$0xff]  }
  0x19   :  { %2594 = vmatpush3.bf16.msra.mxu1 %v2852_v23  ;;  %2573 = vmatprep.subr.bf16.mxu0 %v2853_v24  ;;  %v2897_v22 = vld [vmem:[%s3795_s1 + $0x138] sm:$0xff]   ;;  %v2908_v39 = vld [vmem:[%s3795_s1 + $0x280] sm:$0xff]   ;;  %v2910_v44 = vld [vmem:[%s3795_s1 + $0x2c8] sm:$0xff]  }
  0x1a   :  { %2595 = vmatprep.subr.bf16.mxu1 %v2854_v25  ;;  %v2903_v23 = vld [vmem:[%s3794_s0 + $0xc] ss:$48 sps:$4 sm:$0xff]   ;;  %v2915_v49 = vld [vmem:[%s3795_s1 + $0x210] sm:$0xff]   ;;  %v2921_v55 = vld [vmem:[%s3795_s1 + $0x260] sm:$0xff]  }
  0x1b   :  { %v2904_v24 = vld [vmem:[%s3794_s0 + $0x6c] ss:$48 sps:$4 sm:$0xff]   ;;  %v2916_v50 = vld [vmem:[%s3795_s1 + $0x290] sm:$0xff]  }
  0x1c   :  { %2574 = vmatpush3.bf16.msra.mxu0 %v2855_v26  ;;  %v2898_v25 = vld [vmem:[%s3795_s1 + $0x1b8] sm:$0xff]   ;;  %v110_v26 = vrot.slane %v2899_v20, %v3219_v43  ;;  %v131_v29 = vrot.slane %v2904_v24, %v3219_v43  ;;  %v2911_v45 = vld [vmem:[%s3795_s1 + $0x208] sm:$0xff]  }
  0x1d   :  { %2596 = vmatpush3.bf16.msra.mxu1 %v2856_v27  ;;  %2575 = vmatprep.subr.bf16.mxu0 %v2857_v28  ;;  %v124_v27 = vrot.slane %v2901_v21, %v3219_v43  ;;  %v117_v28 = vrot.slane %v2903_v23, %v3219_v43  ;;  %v2912_v46 = vld [vmem:[%s3795_s1 + $0x288] sm:$0xff]   ;;  %v2917_v51 = vld [vmem:[%s3795_s1 + $0x258] sm:$0xff]  }
  0x1e   :  { %2597 = vmatprep.subr.bf16.mxu1 %v2858_v30  ;;  %v2905_v30 = vld [vmem:[%s3795_s1 + $0x240] sm:$0xff]   ;;  %v2920_v54 = vld [vmem:[%s3795_s1 + $0x298] sm:$0xff]  }
  0x1f   :  { %v135_v34 = vcombine.high %v117_v28, %v131_v29  ;;  %v134_v35 = vcombine.low %v117_v28, %v131_v29  ;;  %v2948_v28 = vld [vmem:[%s3795_s1 + $0x3c8] sm:$0xff]  }
  0x20   :  { %2576 = vmatpush3.bf16.msra.mxu0 %v2859_v31  ;;  %v133_v31 = vcombine.high %v110_v26, %v124_v27  ;;  %v2949_v29 = vld [vmem:[%s3795_s1 + $0x308] sm:$0xff]  }
  0x21   :  { %2598 = vmatpush3.bf16.msra.mxu1 %v2860_v32  ;;  %2605 = vmatprep.subr.bf16.mxu0 %v2867_v41  ;;  %v132_v32 = vcombine.low %v110_v26, %v124_v27  ;;  %v311_v40 = vpack.c.bf16 %v135_v34, %v135_v34  ;;  %v310_v41 = vpack.c.bf16 %v134_v35, %v134_v35  ;;  %v2954_v34 = vld [vmem:[%s3795_s1 + $0x390] sm:$0xff]   ;;  %v2955_v35 = vld [vmem:[%s3795_s1 + $0x358] sm:$0xff]  }
  0x22   :  { %2627 = vmatprep.subr.bf16.mxu1 %v2868_v42  ;;  %v309_v37 = vpack.c.bf16 %v133_v31, %v133_v31  ;;  %v2909_v42 = vld [vmem:[%s3795_s1 + $0x248] sm:$0xff]   ;;  %v2951_v31 = vld [vmem:[%s3795_s1 + $0x350] sm:$0xff]  }
  0x23   :  { %1904 = vmatmul.mubr.bf16.vlgmr.msra.gmra.mrb[0].mxu0 %v304_v56  ;;  %v308_v38 = vpack.c.bf16 %v132_v32, %v132_v32  ;;  %v2922_v56 = vld [vmem:[%s3795_s1 + $0x2e0] sm:$0xff]   ;;  %v2952_v32 = vld [vmem:[%s3795_s1 + $0x3d0] sm:$0xff]  }
  0x24   :  { %1944 = vmatmul.mubr.bf16.vlgmr.msra.gmra.mrb[0].mxu1 %v306_v57  ;;  %2606 = vmatpush3.bf16.msra.mxu0 %v2869_v52  ;;  %v2918_v52 = vld [vmem:[%s3795_s1 + $0x2d8] sm:$0xff]   ;;  %v2923_v57 = vld [vmem:[%s3795_s1 + $0x220] sm:$0xff]  }
  0x25   :  { %2628 = vmatpush3.bf16.msra.mxu1 %v2870_v53  ;;  %2607 = vmatprep.subr.bf16.mxu0 %v2871_v58  ;;  %v2919_v53 = vld [vmem:[%s3795_s1 + $0x218] sm:$0xff]   ;;  %v2924_v58 = vld [vmem:[%s3795_s1 + $0x2a0] sm:$0xff]  }
  0x26   :  { %2629 = vmatprep.subr.bf16.mxu1 %v2872_v59  ;;  %1983 = vmatprep.mubr.bf16.mxu0 %v309_v37  ;;  %v2925_v59 = vld [vmem:[%s3795_s1 + $0x268] sm:$0xff]   ;;  %v2957_v37 = vld [vmem:[%s3795_s1 + $0x318] sm:$0xff]  }
  0x27   :  { %2023 = vmatprep.mubr.bf16.mxu1 %v311_v40  ;;  %v2960_v40 = vld [vmem:[%s3795_s1 + $0x3e0] sm:$0xff]  }
  0x28   :  { %2608 = vmatpush3.bf16.msra.mxu0 %v2873_v60  ;;  %v2926_v60 = vld [vmem:[%s3795_s1 + $0x2e8] sm:$0xff]  }
  0x29   :  { %2630 = vmatpush3.bf16.msra.mxu1 %v2874_v61  ;;  %2609 = vmatprep.subr.bf16.mxu0 %v2875_v62  ;;  %v2927_v61 = vld [vmem:[%s3795_s1 + $0x228] sm:$0xff]  }
  0x2a   :  { %2631 = vmatprep.subr.bf16.mxu1 %v2876_v63  ;;  %v2928_v62 = vld [vmem:[%s3795_s1 + $0x2a8] sm:$0xff]   ;;  %v2929_v63 = vld [vmem:[%s3795_s1 + $0x270] sm:$0xff]  }
  0x2c   :  { %2610 = vmatpush3.bf16.msra.mxu0 %v2877_v0  ;;  %v2930_v0 = vld [vmem:[%s3795_s1 + $0x2f0] sm:$0xff]  }
  0x2d   :  { %2632 = vmatpush3.bf16.msra.mxu1 %v2878_v1  ;;  %2611 = vmatprep.subr.bf16.mxu0 %v2879_v2  ;;  %v2931_v1 = vld [vmem:[%s3795_s1 + $0x230] sm:$0xff]  }
  0x2e   :  { %2633 = vmatprep.subr.bf16.mxu1 %v2880_v3  ;;  %v2932_v2 = vld [vmem:[%s3795_s1 + $0x2b0] sm:$0xff]   ;;  %v2933_v3 = vld [vmem:[%s3795_s1 + $0x278] sm:$0xff]  }
  0x30   :  { %2612 = vmatpush3.bf16.msra.mxu0 %v2881_v4  ;;  %v2934_v4 = vld [vmem:[%s3795_s1 + $0x2f8] sm:$0xff]  }
  0x31   :  { %2634 = vmatpush3.bf16.msra.mxu1 %v2882_v5  ;;  %2613 = vmatprep.subr.bf16.mxu0 %v2883_v6  ;;  %v2935_v5 = vld [vmem:[%s3795_s1 + $0x238] sm:$0xff]  }
  0x32   :  { %2635 = vmatprep.subr.bf16.mxu1 %v2884_v7  ;;  %v2936_v6 = vld [vmem:[%s3795_s1 + $0x2b8] sm:$0xff]   ;;  %v2937_v7 = vld [vmem:[%s3794_s0 + $0x10] ss:$48 sps:$4 sm:$0xff]  }
  0x34   :  { %2614 = vmatpush3.bf16.msra.mxu0 %v2885_v8  ;;  %v2939_v8 = vld [vmem:[%s3794_s0 + $0x70] ss:$48 sps:$4 sm:$0xff]  }
  0x35   :  { %2636 = vmatpush3.bf16.msra.mxu1 %v2886_v9  ;;  %2615 = vmatprep.subr.bf16.mxu0 %v2887_v10  ;;  %v2941_v9 = vld [vmem:[%s3794_s0 + $0x14] ss:$48 sps:$4 sm:$0xff]  }
  0x36   :  { %2637 = vmatprep.subr.bf16.mxu1 %v2888_v11  ;;  %v2942_v10 = vld [vmem:[%s3794_s0 + $0x74] ss:$48 sps:$4 sm:$0xff]   ;;  %v146_v11 = vrot.slane %v2937_v7, %v3219_v43 }
  0x37   :  { %v2984_v7 = vld [vmem:[%s3795_s1 + $0x480] sm:$0xff]  }
  0x38   :  { %2616 = vmatpush3.bf16.msra.mxu0 %v2889_v12  ;;  %v160_v12 = vrot.slane %v2939_v8, %v3219_v43 }
  0x39   :  { %2638 = vmatpush3.bf16.msra.mxu1 %v2890_v13  ;;  %2617 = vmatprep.subr.bf16.mxu0 %v2891_v14  ;;  %v153_v13 = vrot.slane %v2941_v9, %v3219_v43  ;;  %v2943_v14 = vld [vmem:[%s3795_s1 + $0x340] sm:$0xff]  }
  0x3a   :  { %2639 = vmatprep.subr.bf16.mxu1 %v2892_v15  ;;  %v167_v15 = vrot.slane %v2942_v10, %v3219_v43 }
  0x3c   :  { %2618 = vmatpush3.bf16.msra.mxu0 %v2893_v16  ;;  %v2944_v16 = vld [vmem:[%s3795_s1 + $0x3c0] sm:$0xff]   ;;  %v171_v20 = vcombine.high %v153_v13, %v167_v15  ;;  %v170_v21 = vcombine.low %v153_v13, %v167_v15  ;;  %v2986_v13 = vld [vmem:[%s3795_s1 + $0x4c8] sm:$0xff]  }
  0x3d   :  { %2640 = vmatpush3.bf16.msra.mxu1 %v2894_v17  ;;  %2619 = vmatprep.subr.bf16.mxu0 %v2895_v18  ;;  %v169_v17 = vcombine.high %v146_v11, %v160_v12  ;;  %v168_v18 = vcombine.low %v146_v11, %v160_v12  ;;  %v2985_v12 = vld [vmem:[%s3795_s1 + $0x448] sm:$0xff]  }
  0x3e   :  { %2641 = vmatprep.subr.bf16.mxu1 %v2896_v19  ;;  %v2945_v19 = vld [vmem:[%s3795_s1 + $0x300] sm:$0xff]   ;;  %v315_v26 = vpack.c.bf16 %v171_v20, %v171_v20  ;;  %v314_v27 = vpack.c.bf16 %v170_v21, %v170_v21  ;;  %v2988_v15 = vld [vmem:[%s3795_s1 + $0x488] sm:$0xff]   ;;  %v2993_v20 = vld [vmem:[%s3795_s1 + $0x458] sm:$0xff]  }
  0x3f   :  { %v313_v23 = vpack.c.bf16 %v169_v17, %v169_v17  ;;  %v312_v24 = vpack.c.bf16 %v168_v18, %v168_v18  ;;  %v2990_v17 = vld [vmem:[%s3795_s1 + $0x4d0] sm:$0xff]   ;;  %v2994_v21 = vld [vmem:[%s3795_s1 + $0x4d8] sm:$0xff]  }
  0x40   :  { %2620 = vmatpush3.bf16.msra.mxu0 %v2897_v22  ;;  %v2946_v22 = vld [vmem:[%s3795_s1 + $0x380] sm:$0xff]   ;;  %v2991_v18 = vld [vmem:[%s3795_s1 + $0x410] sm:$0xff]  }
  0x41   :  { %2642 = vmatpush3.bf16.msra.mxu1 %v2898_v25  ;;  %2649 = vmatprep.subr.bf16.mxu0 %v2905_v30  ;;  %v2947_v25 = vld [vmem:[%s3795_s1 + $0x348] sm:$0xff]  }
  0x42   :  { %2671 = vmatprep.subr.bf16.mxu1 %v2906_v33  ;;  %v2950_v30 = vld [vmem:[%s3795_s1 + $0x388] sm:$0xff]   ;;  %v2953_v33 = vld [vmem:[%s3795_s1 + $0x310] sm:$0xff]  }
  0x43   :  { %1984 = vmatmul.mubr.bf16.vlgmr.msra.gmra.mrb[4].mxu0 %v308_v38  ;;  %v2958_v38 = vld [vmem:[%s3795_s1 + $0x398] sm:$0xff]  }
  0x44   :  { %2024 = vmatmul.mubr.bf16.vlgmr.msra.gmra.mrb[4].mxu1 %v310_v41  ;;  %2650 = vmatpush3.bf16.msra.mxu0 %v2907_v36  ;;  %v2956_v36 = vld [vmem:[%s3795_s1 + $0x3d8] sm:$0xff]   ;;  %v2961_v41 = vld [vmem:[%s3795_s1 + $0x320] sm:$0xff]  }
  0x45   :  { %2672 = vmatpush3.bf16.msra.mxu1 %v2908_v39  ;;  %2651 = vmatprep.subr.bf16.mxu0 %v2909_v42  ;;  %v2959_v39 = vld [vmem:[%s3795_s1 + $0x360] sm:$0xff]  }
  0x46   :  { %2673 = vmatprep.subr.bf16.mxu1 %v2910_v44  ;;  %2063 = vmatprep.mubr.bf16.mxu0 %v313_v23  ;;  %v2962_v42 = vld [vmem:[%s3795_s1 + $0x3a0] sm:$0xff]   ;;  %v2963_v44 = vld [vmem:[%s3795_s1 + $0x368] sm:$0xff]   ;;  %v2996_v23 = vld [vmem:[%s3795_s1 + $0x498] sm:$0xff]  }
  0x47   :  { %2103 = vmatprep.mubr.bf16.mxu1 %v315_v26  ;;  %v2999_v26 = vld [vmem:[%s3795_s1 + $0x420] sm:$0xff]  }
  0x48   :  { %2652 = vmatpush3.bf16.msra.mxu0 %v2911_v45  ;;  %v2964_v45 = vld [vmem:[%s3795_s1 + $0x3e8] sm:$0xff]  }
  0x49   :  { %2674 = vmatpush3.bf16.msra.mxu1 %v2912_v46  ;;  %2653 = vmatprep.subr.bf16.mxu0 %v2913_v47  ;;  %v2965_v46 = vld [vmem:[%s3795_s1 + $0x328] sm:$0xff]  }
  0x4a   :  { %2675 = vmatprep.subr.bf16.mxu1 %v2914_v48  ;;  %v2966_v47 = vld [vmem:[%s3795_s1 + $0x3a8] sm:$0xff]   ;;  %v2967_v48 = vld [vmem:[%s3795_s1 + $0x370] sm:$0xff]  }
  0x4c   :  { %2654 = vmatpush3.bf16.msra.mxu0 %v2915_v49  ;;  %v2968_v49 = vld [vmem:[%s3795_s1 + $0x3f0] sm:$0xff]  }
  0x4d   :  { %2676 = vmatpush3.bf16.msra.mxu1 %v2916_v50  ;;  %2655 = vmatprep.subr.bf16.mxu0 %v2917_v51  ;;  %v2969_v50 = vld [vmem:[%s3795_s1 + $0x330] sm:$0xff]  }
  0x4e   :  { %2677 = vmatprep.subr.bf16.mxu1 %v2918_v52  ;;  %v2970_v51 = vld [vmem:[%s3795_s1 + $0x3b0] sm:$0xff]   ;;  %v2971_v52 = vld [vmem:[%s3795_s1 + $0x378] sm:$0xff]  }
  0x50   :  { %2656 = vmatpush3.bf16.msra.mxu0 %v2919_v53  ;;  %v2972_v53 = vld [vmem:[%s3795_s1 + $0x3f8] sm:$0xff]  }
  0x51   :  { %2678 = vmatpush3.bf16.msra.mxu1 %v2920_v54  ;;  %2657 = vmatprep.subr.bf16.mxu0 %v2921_v55  ;;  %v2973_v54 = vld [vmem:[%s3795_s1 + $0x338] sm:$0xff]  }
  0x52   :  { %2679 = vmatprep.subr.bf16.mxu1 %v2922_v56  ;;  %v2974_v55 = vld [vmem:[%s3795_s1 + $0x3b8] sm:$0xff]  }
  0x53   :  { %v2975_v56 = vld [vmem:[%s3794_s0 + $0x18] ss:$48 sps:$4 sm:$0xff]  }
  0x54   :  { %2658 = vmatpush3.bf16.msra.mxu0 %v2923_v57  ;;  %v2977_v57 = vld [vmem:[%s3794_s0 + $0x78] ss:$48 sps:$4 sm:$0xff]  }
  0x55   :  { %2680 = vmatpush3.bf16.msra.mxu1 %v2924_v58  ;;  %2659 = vmatprep.subr.bf16.mxu0 %v2925_v59  ;;  %v2979_v58 = vld [vmem:[%s3794_s0 + $0x1c] ss:$48 sps:$4 sm:$0xff]  }
  0x56   :  { %2681 = vmatprep.subr.bf16.mxu1 %v2926_v60  ;;  %v2980_v59 = vld [vmem:[%s3794_s0 + $0x7c] ss:$48 sps:$4 sm:$0xff]   ;;  %v182_v60 = vrot.slane %v2975_v56, %v3219_v43  ;;  %v3022_v56 = vld [vmem:[%s3795_s1 + $0x580] sm:$0xff]  }
  0x58   :  { %2660 = vmatpush3.bf16.msra.mxu0 %v2927_v61  ;;  %v2981_v61 = vld [vmem:[%s3795_s1 + $0x440] sm:$0xff]  }
  0x59   :  { %2682 = vmatpush3.bf16.msra.mxu1 %v2928_v62  ;;  %2661 = vmatprep.subr.bf16.mxu0 %v2929_v63  ;;  %v196_v62 = vrot.slane %v2977_v57, %v3219_v43  ;;  %v189_v63 = vrot.slane %v2979_v58, %v3219_v43 }
  0x5a   :  { %2683 = vmatprep.subr.bf16.mxu1 %v2930_v0  ;;  %v203_v0 = vrot.slane %v2980_v59, %v3219_v43  ;;  %v3023_v59 = vld [vmem:[%s3795_s1 + $0x548] sm:$0xff]  }
  0x5c   :  { %2662 = vmatpush3.bf16.msra.mxu0 %v2931_v1  ;;  %v2982_v1 = vld [vmem:[%s3795_s1 + $0x4c0] sm:$0xff]  }
  0x5d   :  { %2684 = vmatpush3.bf16.msra.mxu1 %v2932_v2  ;;  %2663 = vmatprep.subr.bf16.mxu0 %v2933_v3  ;;  %v205_v2 = vcombine.high %v182_v60, %v196_v62  ;;  %v207_v3 = vcombine.high %v189_v63, %v203_v0 }
  0x5e   :  { %2685 = vmatprep.subr.bf16.mxu1 %v2934_v4  ;;  %v204_v4 = vcombine.low %v182_v60, %v196_v62  ;;  %v3024_v62 = vld [vmem:[%s3795_s1 + $0x5c8] sm:$0xff]  }
  0x5f   :  { %v317_v8 = vpack.c.bf16 %v205_v2, %v205_v2  ;;  %v319_v9 = vpack.c.bf16 %v207_v3, %v207_v3  ;;  %v3028_v2 = vld [vmem:[%s3795_s1 + $0x5d0] sm:$0xff]  }
  0x60   :  { %2664 = vmatpush3.bf16.msra.mxu0 %v2935_v5  ;;  %v206_v5 = vcombine.low %v189_v63, %v203_v0  ;;  %v316_v10 = vpack.c.bf16 %v204_v4, %v204_v4  ;;  %v3025_v63 = vld [vmem:[%s3795_s1 + $0x508] sm:$0xff]   ;;  %v3029_v3 = vld [vmem:[%s3795_s1 + $0x510] sm:$0xff]  }
  0x61   :  { %2686 = vmatpush3.bf16.msra.mxu1 %v2936_v6  ;;  %2693 = vmatprep.subr.bf16.mxu0 %v2943_v14  ;;  %v2983_v6 = vld [vmem:[%s3795_s1 + $0x400] sm:$0xff]   ;;  %v2987_v14 = vld [vmem:[%s3795_s1 + $0x408] sm:$0xff]   ;;  %v3030_v4 = vld [vmem:[%s3795_s1 + $0x590] sm:$0xff]  }
  0x62   :  { %2715 = vmatprep.subr.bf16.mxu1 %v2944_v16  ;;  %v318_v11 = vpack.c.bf16 %v206_v5, %v206_v5  ;;  %v2989_v16 = vld [vmem:[%s3795_s1 + $0x450] sm:$0xff]   ;;  %v3026_v0 = vld [vmem:[%s3795_s1 + $0x588] sm:$0xff]   ;;  %v3031_v5 = vld [vmem:[%s3795_s1 + $0x558] sm:$0xff]  }
  0x63   :  { %2064 = vmatmul.mubr.bf16.vlgmr.msra.gmra.mrb[8].mxu0 %v312_v24  ;;  %v2997_v24 = vld [vmem:[%s3795_s1 + $0x460] sm:$0xff]  }
  0x64   :  { %2104 = vmatmul.mubr.bf16.vlgmr.msra.gmra.mrb[8].mxu1 %v314_v27  ;;  %2694 = vmatpush3.bf16.msra.mxu0 %v2945_v19  ;;  %v2992_v19 = vld [vmem:[%s3795_s1 + $0x490] sm:$0xff]   ;;  %v3000_v27 = vld [vmem:[%s3795_s1 + $0x4a0] sm:$0xff]  }
  0x65   :  { %2716 = vmatpush3.bf16.msra.mxu1 %v2946_v22  ;;  %2695 = vmatprep.subr.bf16.mxu0 %v2947_v25  ;;  %v2995_v22 = vld [vmem:[%s3795_s1 + $0x418] sm:$0xff]   ;;  %v2998_v25 = vld [vmem:[%s3795_s1 + $0x4e0] sm:$0xff]  }
  0x66   :  { %2717 = vmatprep.subr.bf16.mxu1 %v2948_v28  ;;  %2143 = vmatprep.mubr.bf16.mxu0 %v317_v8  ;;  %v3001_v28 = vld [vmem:[%s3795_s1 + $0x468] sm:$0xff]   ;;  %v3034_v8 = vld [vmem:[%s3795_s1 + $0x598] sm:$0xff]  }
  0x67   :  { %2183 = vmatprep.mubr.bf16.mxu1 %v319_v9  ;;  %v3035_v9 = vld [vmem:[%s3795_s1 + $0x560] sm:$0xff]  }
  0x68   :  { %2696 = vmatpush3.bf16.msra.mxu0 %v2949_v29  ;;  %v3002_v29 = vld [vmem:[%s3795_s1 + $0x4e8] sm:$0xff]  }
  0x69   :  { %2718 = vmatpush3.bf16.msra.mxu1 %v2950_v30  ;;  %2697 = vmatprep.subr.bf16.mxu0 %v2951_v31  ;;  %v3003_v30 = vld [vmem:[%s3795_s1 + $0x428] sm:$0xff]  }
  0x6a   :  { %2719 = vmatprep.subr.bf16.mxu1 %v2952_v32  ;;  %v3004_v31 = vld [vmem:[%s3795_s1 + $0x4a8] sm:$0xff]   ;;  %v3005_v32 = vld [vmem:[%s3795_s1 + $0x470] sm:$0xff]  }
  0x6c   :  { %2698 = vmatpush3.bf16.msra.mxu0 %v2953_v33  ;;  %v3006_v33 = vld [vmem:[%s3795_s1 + $0x4f0] sm:$0xff]  }
  0x6d   :  { %2720 = vmatpush3.bf16.msra.mxu1 %v2954_v34  ;;  %2699 = vmatprep.subr.bf16.mxu0 %v2955_v35  ;;  %v3007_v34 = vld [vmem:[%s3795_s1 + $0x430] sm:$0xff]  }
  0x6e   :  { %2721 = vmatprep.subr.bf16.mxu1 %v2956_v36  ;;  %v3008_v35 = vld [vmem:[%s3795_s1 + $0x4b0] sm:$0xff]   ;;  %v3009_v36 = vld [vmem:[%s3795_s1 + $0x478] sm:$0xff]  }
  0x70   :  { %2700 = vmatpush3.bf16.msra.mxu0 %v2957_v37  ;;  %v3010_v37 = vld [vmem:[%s3795_s1 + $0x4f8] sm:$0xff]  }
  0x71   :  { %2722 = vmatpush3.bf16.msra.mxu1 %v2958_v38  ;;  %2701 = vmatprep.subr.bf16.mxu0 %v2959_v39  ;;  %v3011_v38 = vld [vmem:[%s3795_s1 + $0x438] sm:$0xff]  }
  0x72   :  { %2723 = vmatprep.subr.bf16.mxu1 %v2960_v40  ;;  %v3012_v39 = vld [vmem:[%s3795_s1 + $0x4b8] sm:$0xff]   ;;  %v3013_v40 = vld [vmem:[%s3794_s0 + $0x20] ss:$48 sps:$4 sm:$0xff]  }
  0x74   :  { %2702 = vmatpush3.bf16.msra.mxu0 %v2961_v41  ;;  %v3015_v41 = vld [vmem:[%s3794_s0 + $0x80] ss:$48 sps:$4 sm:$0xff]  }
  0x75   :  { %2724 = vmatpush3.bf16.msra.mxu1 %v2962_v42  ;;  %2703 = vmatprep.subr.bf16.mxu0 %v2963_v44  ;;  %v3017_v42 = vld [vmem:[%s3794_s0 + $0x24] ss:$48 sps:$4 sm:$0xff]  }
  0x76   :  { %2725 = vmatprep.subr.bf16.mxu1 %v2964_v45  ;;  %v3018_v44 = vld [vmem:[%s3794_s0 + $0x84] ss:$48 sps:$4 sm:$0xff]   ;;  %v218_v45 = vrot.slane %v3013_v40, %v3219_v43 }
  0x78   :  { %2704 = vmatpush3.bf16.msra.mxu0 %v2965_v46  ;;  %v232_v46 = vrot.slane %v3015_v41, %v3219_v43 }
  0x79   :  { %2726 = vmatpush3.bf16.msra.mxu1 %v2966_v47  ;;  %2705 = vmatprep.subr.bf16.mxu0 %v2967_v48  ;;  %v3019_v47 = vld [vmem:[%s3795_s1 + $0x540] sm:$0xff]   ;;  %v225_v48 = vrot.slane %v3017_v42, %v3219_v43 }
  0x7a   :  { %2727 = vmatprep.subr.bf16.mxu1 %v2968_v49  ;;  %v239_v49 = vrot.slane %v3018_v44, %v3219_v43  ;;  %v2368_v44 = vld [vmem:[%s3796_s2] ss:$0 sm:$0xff] }
  0x7c   :  { %2706 = vmatpush3.bf16.msra.mxu0 %v2969_v50  ;;  %v3020_v50 = vld [vmem:[%s3795_s1 + $0x5c0] sm:$0xff]  }
  0x7d   :  { %2728 = vmatpush3.bf16.msra.mxu1 %v2970_v51  ;;  %2707 = vmatprep.subr.bf16.mxu0 %v2971_v52  ;;  %v241_v51 = vcombine.high %v218_v45, %v232_v46  ;;  %v240_v52 = vcombine.low %v218_v45, %v232_v46 }
  0x7e   :  { %2729 = vmatprep.subr.bf16.mxu1 %v2972_v53  ;;  %v3021_v53 = vld [vmem:[%s3795_s1 + $0x500] sm:$0xff]  }
  0x7f   :  { %v321_v57 = vpack.c.bf16 %v241_v51, %v241_v51  ;;  %v320_v58 = vpack.c.bf16 %v240_v52, %v240_v52 }
  0x80   :  { %2708 = vmatpush3.bf16.msra.mxu0 %v2973_v54  ;;  %v243_v54 = vcombine.high %v225_v48, %v239_v49 }
  0x81   :  { %2730 = vmatpush3.bf16.msra.mxu1 %v2974_v55  ;;  %2737 = vmatprep.subr.bf16.mxu0 %v2981_v61  ;;  %v242_v55 = vcombine.low %v225_v48, %v239_v49 }
  0x82   :  { %2759 = vmatprep.subr.bf16.mxu1 %v2982_v1  ;;  %v323_v60 = vpack.c.bf16 %v243_v54, %v243_v54  ;;  %v3027_v1 = vld [vmem:[%s3795_s1 + $0x550] sm:$0xff]  }
  0x83   :  { %2144 = vmatmul.mubr.bf16.vlgmr.msra.gmra.mrb[12].mxu0 %v316_v10  ;;  %v322_v61 = vpack.c.bf16 %v242_v55, %v242_v55  ;;  %v3036_v10 = vld [vmem:[%s3795_s1 + $0x5e0] sm:$0xff]  }
  0x84   :  { %2184 = vmatmul.mubr.bf16.vlgmr.msra.gmra.mrb[12].mxu1 %v318_v11  ;;  %2738 = vmatpush3.bf16.msra.mxu0 %v2983_v6  ;;  %v3032_v6 = vld [vmem:[%s3795_s1 + $0x5d8] sm:$0xff]   ;;  %v3037_v11 = vld [vmem:[%s3795_s1 + $0x520] sm:$0xff]  }
  0x85   :  { %2760 = vmatpush3.bf16.msra.mxu1 %v2984_v7  ;;  %2739 = vmatprep.subr.bf16.mxu0 %v2985_v12  ;;  %v3033_v7 = vld [vmem:[%s3795_s1 + $0x518] sm:$0xff]   ;;  %v3038_v12 = vld [vmem:[%s3795_s1 + $0x5a0] sm:$0xff]  }
  0x86   :  { %2761 = vmatprep.subr.bf16.mxu1 %v2986_v13  ;;  %2223 = vmatprep.mubr.bf16.mxu0 %v321_v57  ;;  %v3039_v13 = vld [vmem:[%s3795_s1 + $0x568] sm:$0xff]  }
  0x87   :  { %2263 = vmatprep.mubr.bf16.mxu1 %v323_v60 }
  0x88   :  { %2740 = vmatpush3.bf16.msra.mxu0 %v2987_v14  ;;  %v3040_v14 = vld [vmem:[%s3795_s1 + $0x5e8] sm:$0xff]  }
  0x89   :  { %2762 = vmatpush3.bf16.msra.mxu1 %v2988_v15  ;;  %2741 = vmatprep.subr.bf16.mxu0 %v2989_v16  ;;  %v3041_v15 = vld [vmem:[%s3795_s1 + $0x528] sm:$0xff]  }
  0x8a   :  { %2763 = vmatprep.subr.bf16.mxu1 %v2990_v17  ;;  %v3042_v16 = vld [vmem:[%s3795_s1 + $0x5a8] sm:$0xff]   ;;  %v3043_v17 = vld [vmem:[%s3795_s1 + $0x570] sm:$0xff]  }
  0x8c   :  { %2742 = vmatpush3.bf16.msra.mxu0 %v2991_v18  ;;  %v3044_v18 = vld [vmem:[%s3795_s1 + $0x5f0] sm:$0xff]  }
  0x8d   :  { %2764 = vmatpush3.bf16.msra.mxu1 %v2992_v19  ;;  %2743 = vmatprep.subr.bf16.mxu0 %v2993_v20  ;;  %v3045_v19 = vld [vmem:[%s3795_s1 + $0x530] sm:$0xff]  }
  0x8e   :  { %2765 = vmatprep.subr.bf16.mxu1 %v2994_v21  ;;  %v3046_v20 = vld [vmem:[%s3795_s1 + $0x5b0] sm:$0xff]   ;;  %v3047_v21 = vld [vmem:[%s3795_s1 + $0x578] sm:$0xff]  }
  0x90   :  { %2744 = vmatpush3.bf16.msra.mxu0 %v2995_v22  ;;  %v3048_v22 = vld [vmem:[%s3795_s1 + $0x5f8] sm:$0xff]  }
  0x91   :  { %2766 = vmatpush3.bf16.msra.mxu1 %v2996_v23  ;;  %2745 = vmatprep.subr.bf16.mxu0 %v2997_v24  ;;  %v3049_v23 = vld [vmem:[%s3795_s1 + $0x538] sm:$0xff]  }
  0x92   :  { %2767 = vmatprep.subr.bf16.mxu1 %v2998_v25  ;;  %v3050_v24 = vld [vmem:[%s3795_s1 + $0x5b8] sm:$0xff]  }
  0x93   :  { %v3051_v25 = vld [vmem:[%s3794_s0 + $0x28] ss:$48 sps:$4 sm:$0xff]  }
  0x94   :  { %2746 = vmatpush3.bf16.msra.mxu0 %v2999_v26  ;;  %v3053_v26 = vld [vmem:[%s3794_s0 + $0x88] ss:$48 sps:$4 sm:$0xff]  }
  0x95   :  { %2768 = vmatpush3.bf16.msra.mxu1 %v3000_v27  ;;  %2747 = vmatprep.subr.bf16.mxu0 %v3001_v28  ;;  %v3055_v27 = vld [vmem:[%s3794_s0 + $0x2c] ss:$48 sps:$4 sm:$0xff]  }
  0x96   :  { %2769 = vmatprep.subr.bf16.mxu1 %v3002_v29  ;;  %v3056_v28 = vld [vmem:[%s3794_s0 + $0x8c] ss:$48 sps:$4 sm:$0xff]   ;;  %v254_v29 = vrot.slane %v3051_v25, %v3219_v43 }
  0x98   :  { %2748 = vmatpush3.bf16.msra.mxu0 %v3003_v30  ;;  %v268_v30 = vrot.slane %v3053_v26, %v3219_v43 }
  0x99   :  { %2770 = vmatpush3.bf16.msra.mxu1 %v3004_v31  ;;  %2749 = vmatprep.subr.bf16.mxu0 %v3005_v32  ;;  %v261_v31 = vrot.slane %v3055_v27, %v3219_v43  ;;  %v275_v32 = vrot.slane %v3056_v28, %v3219_v43 }
  0x9a   :  { %2771 = vmatprep.subr.bf16.mxu1 %v3006_v33  ;;  %v277_v33 = vcombine.high %v254_v29, %v268_v30 }
  0x9c   :  { %2750 = vmatpush3.bf16.msra.mxu0 %v3007_v34  ;;  %v276_v34 = vcombine.low %v254_v29, %v268_v30 }
  0x9d   :  { %2772 = vmatpush3.bf16.msra.mxu1 %v3008_v35  ;;  %2751 = vmatprep.subr.bf16.mxu0 %v3009_v36  ;;  %v279_v35 = vcombine.high %v261_v31, %v275_v32  ;;  %v278_v36 = vcombine.low %v261_v31, %v275_v32 }
  0x9e   :  { %2773 = vmatprep.subr.bf16.mxu1 %v3010_v37  ;;  %v325_v37 = vpack.c.bf16 %v277_v33, %v277_v33 }
  0x9f   :  { %v326_v40 = vpack.c.bf16 %v278_v36, %v278_v36 }
  0xa0   :  { %2752 = vmatpush3.bf16.msra.mxu0 %v3011_v38  ;;  %v324_v38 = vpack.c.bf16 %v276_v34, %v276_v34 }
  0xa1   :  { %2774 = vmatpush3.bf16.msra.mxu1 %v3012_v39  ;;  %2781 = vmatprep.subr.bf16.mxu0 %v3019_v47  ;;  %v327_v39 = vpack.c.bf16 %v279_v35, %v279_v35 }
  0xa2   :  { %2803 = vmatprep.subr.bf16.mxu1 %v3020_v50 }
  0xa3   :  { %2224 = vmatmul.mubr.bf16.vlgmr.msra.gmra.mrb[16].mxu0 %v320_v58 }
  0xa4   :  { %2264 = vmatmul.mubr.bf16.vlgmr.msra.gmra.mrb[16].mxu1 %v322_v61  ;;  %2782 = vmatpush3.bf16.msra.mxu0 %v3021_v53 }
  0xa5   :  { %2804 = vmatpush3.bf16.msra.mxu1 %v3022_v56  ;;  %2783 = vmatprep.subr.bf16.mxu0 %v3023_v59 }
  0xa6   :  { %2805 = vmatprep.subr.bf16.mxu1 %v3024_v62  ;;  %2303 = vmatprep.mubr.bf16.mxu0 %v325_v37 }
  0xa7   :  { %2343 = vmatprep.mubr.bf16.mxu1 %v327_v39 }
  0xa8   :  { %2784 = vmatpush3.bf16.msra.mxu0 %v3025_v63 }
  0xa9   :  { %2806 = vmatpush3.bf16.msra.mxu1 %v3026_v0  ;;  %2785 = vmatprep.subr.bf16.mxu0 %v3027_v1 }
  0xaa   :  { %2807 = vmatprep.subr.bf16.mxu1 %v3028_v2 }
  0xac   :  { %2786 = vmatpush3.bf16.msra.mxu0 %v3029_v3 }
  0xad   :  { %2808 = vmatpush3.bf16.msra.mxu1 %v3030_v4  ;;  %2787 = vmatprep.subr.bf16.mxu0 %v3031_v5 }
  0xae   :  { %2809 = vmatprep.subr.bf16.mxu1 %v3032_v6 }
  0xb0   :  { %2788 = vmatpush3.bf16.msra.mxu0 %v3033_v7 }
  0xb1   :  { %2810 = vmatpush3.bf16.msra.mxu1 %v3034_v8  ;;  %2789 = vmatprep.subr.bf16.mxu0 %v3035_v9 }
  0xb2   :  { %2811 = vmatprep.subr.bf16.mxu1 %v3036_v10 }
  0xb4   :  { %2790 = vmatpush3.bf16.msra.mxu0 %v3037_v11 }
  0xb5   :  { %2812 = vmatpush3.bf16.msra.mxu1 %v3038_v12  ;;  %2791 = vmatprep.subr.bf16.mxu0 %v3039_v13 }
  0xb6   :  { %2813 = vmatprep.subr.bf16.mxu1 %v3040_v14 }
  0xb8   :  { %2792 = vmatpush3.bf16.msra.mxu0 %v3041_v15 }
  0xb9   :  { %2814 = vmatpush3.bf16.msra.mxu1 %v3042_v16  ;;  %2793 = vmatprep.subr.bf16.mxu0 %v3043_v17 }
  0xba   :  { %2815 = vmatprep.subr.bf16.mxu1 %v3044_v18 }
  0xbc   :  { %2794 = vmatpush3.bf16.msra.mxu0 %v3045_v19 }
  0xbd   :  { %2816 = vmatpush3.bf16.msra.mxu1 %v3046_v20  ;;  %2795 = vmatprep.subr.bf16.mxu0 %v3047_v21 }
  0xbe   :  { %2817 = vmatprep.subr.bf16.mxu1 %v3048_v22 }
  0xc0   :  { %2796 = vmatpush3.bf16.msra.mxu0 %v3049_v23 }
  0xc1   :  { %2818 = vmatpush3.bf16.msra.mxu1 %v3050_v24 }
  0xc3   :  { %2304 = vmatmul.mubr.bf16.vlgmr.msra.gmra.mrb[20].mxu0 %v324_v38 }
  0xc4   :  { %2344 = vmatmul.mubr.bf16.vlgmr.msra.gmra.mrb[20].mxu1 %v326_v40 }
  0xf6   :  { %v2577_v41 = vpop.f32.mrb[0].mxu0 }
  0xf7   :  { %v2599_v42 = vpop.f32.mrb[0].mxu1  ;;  %v2578_v43 = vpop.f32.mrb[1].mxu0 }
  0xf8   :  { %v2600_v45 = vpop.f32.mrb[1].mxu1  ;;  %v2579_v46 = vadd.f32 %v2578_v43, %v2577_v41  ;;  %v2580_v48 = vpop.f32.mrb[2].mxu0 }
  0xf9   :  { %v2601_v47 = vadd.f32 %v2600_v45, %v2599_v42  ;;  %v2602_v49 = vpop.f32.mrb[2].mxu1  ;;  %v2581_v50 = vpop.f32.mrb[3].mxu0 }
  0xfa   :  { %v2603_v51 = vpop.f32.mrb[3].mxu1  ;;  %v1906_v52 = vadd.f32 %v2579_v46, %v2368_v44 }
  0xfc   :  { %v1946_v53 = vadd.f32 %v2601_v47, %v1906_v52 }
 0x116   :  { %v2621_v54 = vpop.f32.mrb[4].mxu0 }
 0x117   :  { %v2643_v55 = vpop.f32.mrb[4].mxu1  ;;  %v2622_v56 = vpop.f32.mrb[5].mxu0 }
 0x118   :  { %v2644_v57 = vpop.f32.mrb[5].mxu1  ;;  %v2623_v58 = vadd.f32 %v2622_v56, %v2621_v54  ;;  %v2624_v60 = vpop.f32.mrb[6].mxu0 }
 0x119   :  { %v2645_v59 = vadd.f32 %v2644_v57, %v2643_v55  ;;  %v2646_v61 = vpop.f32.mrb[6].mxu1  ;;  %v2625_v62 = vpop.f32.mrb[7].mxu0 }
 0x11a   :  { %v2647_v63 = vpop.f32.mrb[7].mxu1  ;;  %v1986_v0 = vadd.f32 %v2623_v58, %v1946_v53 }
 0x11c   :  { %v2026_v1 = vadd.f32 %v2645_v59, %v1986_v0 }
 0x136   :  { %v2665_v2 = vpop.f32.mrb[8].mxu0 }
 0x137   :  { %v2687_v3 = vpop.f32.mrb[8].mxu1  ;;  %v2666_v4 = vpop.f32.mrb[9].mxu0 }
 0x138   :  { %v2667_v5 = vadd.f32 %v2666_v4, %v2665_v2  ;;  %v2688_v6 = vpop.f32.mrb[9].mxu1  ;;  %v2668_v7 = vpop.f32.mrb[10].mxu0 }
 0x139   :  { %v2689_v8 = vadd.f32 %v2688_v6, %v2687_v3  ;;  %v2690_v9 = vpop.f32.mrb[10].mxu1  ;;  %v2669_v10 = vpop.f32.mrb[11].mxu0 }
 0x13a   :  { %v2066_v11 = vadd.f32 %v2667_v5, %v2026_v1  ;;  %v2691_v12 = vpop.f32.mrb[11].mxu1 }
 0x13c   :  { %v2106_v13 = vadd.f32 %v2689_v8, %v2066_v11 }
 0x156   :  { %v2709_v14 = vpop.f32.mrb[12].mxu0 }
 0x157   :  { %v2731_v15 = vpop.f32.mrb[12].mxu1  ;;  %v2710_v16 = vpop.f32.mrb[13].mxu0 }
 0x158   :  { %v2732_v17 = vpop.f32.mrb[13].mxu1  ;;  %v2711_v18 = vadd.f32 %v2710_v16, %v2709_v14  ;;  %v2712_v20 = vpop.f32.mrb[14].mxu0 }
 0x159   :  { %v2733_v19 = vadd.f32 %v2732_v17, %v2731_v15  ;;  %v2734_v21 = vpop.f32.mrb[14].mxu1  ;;  %v2713_v22 = vpop.f32.mrb[15].mxu0 }
 0x15a   :  { %v2735_v23 = vpop.f32.mrb[15].mxu1  ;;  %v2146_v24 = vadd.f32 %v2711_v18, %v2106_v13 }
 0x15c   :  { %v2186_v25 = vadd.f32 %v2733_v19, %v2146_v24 }
 0x176   :  { %v2753_v26 = vpop.f32.mrb[16].mxu0 }
 0x177   :  { %v2775_v27 = vpop.f32.mrb[16].mxu1  ;;  %v2754_v28 = vpop.f32.mrb[17].mxu0 }
 0x178   :  { %v2755_v29 = vadd.f32 %v2754_v28, %v2753_v26  ;;  %v2776_v30 = vpop.f32.mrb[17].mxu1  ;;  %v2756_v31 = vpop.f32.mrb[18].mxu0 }
 0x179   :  { %v2777_v32 = vadd.f32 %v2776_v30, %v2775_v27  ;;  %v2778_v33 = vpop.f32.mrb[18].mxu1  ;;  %v2757_v34 = vpop.f32.mrb[19].mxu0 }
 0x17a   :  { %v2226_v35 = vadd.f32 %v2755_v29, %v2186_v25  ;;  %v2779_v36 = vpop.f32.mrb[19].mxu1 }
 0x17c   :  { %v2266_v37 = vadd.f32 %v2777_v32, %v2226_v35 }
 0x196   :  { %v2797_v38 = vpop.f32.mrb[20].mxu0 }
 0x197   :  { %v2819_v39 = vpop.f32.mrb[20].mxu1  ;;  %v2798_v40 = vpop.f32.mrb[21].mxu0 }
 0x198   :  { %v2799_v41 = vadd.f32 %v2798_v40, %v2797_v38  ;;  %v2820_v42 = vpop.f32.mrb[21].mxu1  ;;  %v2800_v44 = vpop.f32.mrb[22].mxu0 }
 0x199   :  { %v2821_v43 = vadd.f32 %v2820_v42, %v2819_v39  ;;  %v2822_v45 = vpop.f32.mrb[22].mxu1  ;;  %v2801_v46 = vpop.f32.mrb[23].mxu0 }
 0x19a   :  { %v2306_v47 = vadd.f32 %v2799_v41, %v2266_v37  ;;  %v2823_v48 = vpop.f32.mrb[23].mxu1 }
 0x19c   :  { %v2346_v49 = vadd.f32 %v2821_v43, %v2306_v47 }
 0x19e   :  { %2351 = vst [vmem:[#allocation2] sm:$0xff] %v2346_v49 }
 0x19f   :  { %2356 = vsyncadd [#allocation3], 96  ;;  %s3082_s2 = smov [#allocation2]  }
 0x1a0   :  { %s2357_s12 = sshll.u32 %s3082_s2, 4  ;;  %s2358_s12 = int_to_ptr.vmem [resolvable:$true] %s2357_s12 }
 0x1a1   :  { %s3057_s13 = scalar_lea.vmem %s2358_s12, 32  ;;  %s3061_s14 = scalar_lea.vmem %s2358_s12, 128 }
 0x1a2   :  { %p3058_p0 = scmp.ne.s32.totalorder %s2358_s12, %s3057_s13  ;;  %p3062_p1 = scmp.lt.s32.totalorder %s2358_s12, %s2358_s12 }
 0x1a3   :  { %p3063_p2 = scmp.lt.s32.totalorder %s3061_s14, %s3057_s13 }
 0x1a5   :  { %p3064_p3 = por %p3063_p2, %p3062_p1 }
 0x1a7   :  { %p3065_p4 = pnand %p3064_p3, %p3058_p0 }
 0x1a9   :  { %3068 = shalt.err (!%p3065_p4)
}
 0x1aa   :  { %s3069_s17 = scalar_lea.hbm %s3797_s3, 32 }
 0x1ab   :  { %p3070_p5 = scmp.ne.s32.totalorder %s3797_s3, %s3069_s17  ;;  %p3073_p6 = scmp.lt.u32.totalorder %s3069_s17, %s3797_s3 }
 0x1ad   :  { %p3075_p7 = pnand %p3073_p6, %p3070_p5 }
 0x1af   :  { %3078 = shalt.err (!%p3075_p7)
}
 0x1b0   :  { %s3083_s22 = smov 32   ;;  %s3084_s23 = smov 2  }
 0x1b1   :  { %2363 = dma.vmem_to_hbm [thread:$0]  %s2358_s12, 32, %s3797_s3, [#allocation3], %s3083_s22, %s3083_s22, %s3084_s23  }
 0x1b2   :  { %3079 = dma.done.wait [#allocation3], 128  }
 0x1b3   :  { %3080 = vsyncadd [#allocation3], 4294967168 }
 0x1b4   :  { %2367 = vsyncpa [#allocation3], 1 }

</bundles_post_ra>
